<compile_context>
chip_gen: v7x
topology: tpu7x:2x2x1
jax: 0.10.0
libtpu: 0.0.40
codegen_flags: <defaults>
</compile_context>

<pallas_src>
import jax
import jax.numpy as jnp
from jax.experimental import pallas as pl
from jax.experimental.pallas import tpu as pltpu

S_DIM = 8
A_DIM = 4
H1 = 400
H2 = 300
BATCH = 2


def critic_kernel(x_ref, a_ref,
                  w1x_ref, w1a_ref, b1_ref,
                  w2_ref, b2_ref,
                  w5_ref, b5_ref,
                  w36_ref, b36_ref,
                  q_ref):
    f32 = jnp.float32
    bf16 = jnp.bfloat16

    x = x_ref[...].astype(bf16)                      # (tb, S)
    a = a_ref[...].astype(bf16)                      # (tb, A)

    # ---- Layer 1, both heads fused (cols [0:H1] = Q1 head, [H1:2H1] = Q2 head).
    # concat([x, a]) is avoided by splitting the weight rows at pack time.
    h1 = (jnp.dot(x, w1x_ref[...], preferred_element_type=f32)
          + jnp.dot(a, w1a_ref[...], preferred_element_type=f32)
          + b1_ref[...])
    h1 = jnp.maximum(h1, 0.0).astype(bf16)           # (tb, 2*H1)

    # ---- Layer 2, per head (block-diag fusion here would double weight bytes).
    h2a = jnp.maximum(
        jnp.dot(h1[:, :H1], w2_ref[...], preferred_element_type=f32) + b2_ref[...],
        0.0)                                         # (tb, H2)
    h2b = jnp.maximum(
        jnp.dot(h1[:, H1:], w5_ref[...], preferred_element_type=f32) + b5_ref[...],
        0.0)                                         # (tb, H2)

    # ---- Layer 3, both heads fused via a tiny (2*H2, 2) block-diagonal weight:
    # one matmul, one lane-dense (tb, 2) output write.
    h2 = jnp.concatenate([h2a.astype(bf16), h2b.astype(bf16)], axis=1)  # (tb, 2*H2)
    q_ref[...] = jnp.dot(h2, w36_ref[...], preferred_element_type=f32) + b36_ref[...]


def _round_up(x, m):
    return (x + m - 1) // m * m


def critic_forward(x, a, packed_params, *, block_b=256):
    """x: (B, s_dim), a: (B, a_dim) -> (q1, q2), each (B, 1) float32."""
    (w1x, w1a, b1, w2, b2, w5, b5, w36, b36) = packed_params
    B = x.shape[0]

    # Batch tiling: single whole-batch block for small B; otherwise 256-row
    # tiles (MXU-friendly) with zero padding of the tail tile.
    tb = B if B <= block_b else block_b
    padded_b = _round_up(B, tb)
    if padded_b != B:
        x = jnp.pad(x, ((0, padded_b - B), (0, 0)))
        a = jnp.pad(a, ((0, padded_b - B), (0, 0)))
    grid_b = padded_b // tb

    vmem = pltpu.MemorySpace.VMEM

    def const_spec(arr):
        # Whole-array block, same block index every grid step -> stays resident
        # in VMEM across the batch grid (weights are DMA'd once, not per tile).
        return pl.BlockSpec(arr.shape, lambda i: (0, 0), memory_space=vmem)

    in_specs = [
        pl.BlockSpec((tb, x.shape[1]), lambda i: (i, 0), memory_space=vmem),
        pl.BlockSpec((tb, a.shape[1]), lambda i: (i, 0), memory_space=vmem),
        const_spec(w1x), const_spec(w1a), const_spec(b1),
        const_spec(w2), const_spec(b2),
        const_spec(w5), const_spec(b5),
        const_spec(w36), const_spec(b36),
    ]
    out_specs = pl.BlockSpec((tb, 2), lambda i: (i, 0), memory_space=vmem)

    q = pl.pallas_call(
        critic_kernel,
        out_shape=jax.ShapeDtypeStruct((padded_b, 2), jnp.float32),
        grid=(grid_b,),
        in_specs=in_specs,
        out_specs=out_specs,
        compiler_params=pltpu.CompilerParams(
            dimension_semantics=("parallel",)),   # shard batch tiles across TCs (v7x)
    )(x, a, w1x, w1a, b1, w2, b2, w5, b5, w36, b36)

    q = q[:B]
    return q[:, 0:1], q[:, 1:2]


# ------------------------- parameter construction ---------------------------

def init_linear(key, fan_in, fan_out):
    """PyTorch nn.Linear-style init: U(-1/sqrt(fan_in), 1/sqrt(fan_in))."""
    kw, kb = jax.random.split(key)
    bound = 1.0 / jnp.sqrt(jnp.float32(fan_in))
    w = jax.random.uniform(kw, (fan_in, fan_out), jnp.float32, -bound, bound)
    b = jax.random.uniform(kb, (1, fan_out), jnp.float32, -bound, bound)
    return w, b


def make_params(key, s_dim, a_dim):
    """Raw f32 per-layer params, laid out as (in, out) so each layer is x @ W + b."""
    keys = jax.random.split(key, 6)
    in_dim = s_dim + a_dim
    w1, b1 = init_linear(keys[0], in_dim, H1)
    w2, b2 = init_linear(keys[1], H1, H2)
    w3, b3 = init_linear(keys[2], H2, 1)
    w4, b4 = init_linear(keys[3], in_dim, H1)
    w5, b5 = init_linear(keys[4], H1, H2)
    w6, b6 = init_linear(keys[5], H2, 1)
    return (w1, b1, w2, b2, w3, b3, w4, b4, w5, b5, w6, b6)


def pack_params(raw):
    """Repack raw per-layer f32 params into the fused bf16 kernel layout."""
    w1, b1, w2, b2, w3, b3, w4, b4, w5, b5, w6, b6 = raw
    bf16 = jnp.bfloat16

    # Fused layer 1: heads concatenated along the output dim; rows split at
    # S_DIM so the kernel never needs concat([x, a]).
    w14 = jnp.concatenate([w1, w4], axis=1)            # (S+A, 2*H1)
    w1x = w14[:S_DIM].astype(bf16)                     # (S,   2*H1)
    w1a = w14[S_DIM:].astype(bf16)                     # (A,   2*H1)
    b14 = jnp.concatenate([b1, b4], axis=1)            # (1,   2*H1) f32

    # Fused layer 3: tiny block-diagonal (2*H2, 2) weight.
    w36 = jnp.zeros((2 * H2, 2), jnp.float32)
    w36 = w36.at[:H2, 0].set(w3[:, 0]).at[H2:, 1].set(w6[:, 0])
    b36 = jnp.concatenate([b3, b6], axis=1)            # (1, 2) f32

    return (w1x, w1a, b14,
            w2.astype(bf16), b2,
            w5.astype(bf16), b5,
            w36.astype(bf16), b36)


# ------------------------------- references ---------------------------------

def critic_reference_packed(x, a, packed):
    """Pure-JAX reference with the exact same dtype handling as the kernel."""
    w1x, w1a, b1, w2, b2, w5, b5, w36, b36 = packed
    f32, bf16 = jnp.float32, jnp.bfloat16
    xb, ab = x.astype(bf16), a.astype(bf16)
    h1 = (jnp.dot(xb, w1x, preferred_element_type=f32)
          + jnp.dot(ab, w1a, preferred_element_type=f32) + b1)
    h1 = jnp.maximum(h1, 0.0).astype(bf16)
    h2a = jnp.maximum(jnp.dot(h1[:, :H1], w2, preferred_element_type=f32) + b2, 0.0)
    h2b = jnp.maximum(jnp.dot(h1[:, H1:], w5, preferred_element_type=f32) + b5, 0.0)
    h2 = jnp.concatenate([h2a.astype(bf16), h2b.astype(bf16)], axis=1)
    q = jnp.dot(h2, w36, preferred_element_type=f32) + b36
    return q[:, 0:1], q[:, 1:2]


def critic_reference_f32(x, a, raw):
    """Plain f32 reference of the original PyTorch module semantics."""
    w1, b1, w2, b2, w3, b3, w4, b4, w5, b5, w6, b6 = raw
    xa = jnp.concatenate([x, a], axis=1)
    h = jnp.maximum(xa @ w1 + b1, 0.0)
    h = jnp.maximum(h @ w2 + b2, 0.0)
    q1 = h @ w3 + b3
    g = jnp.maximum(xa @ w4 + b4, 0.0)
    g = jnp.maximum(g @ w5 + b5, 0.0)
    q2 = g @ w6 + b6
    return q1, q2


if __name__ == "__main__":
    key = jax.random.PRNGKey(0)
    kx, ka, kp = jax.random.split(key, 3)

    x = jax.random.normal(kx, (BATCH, S_DIM), jnp.float32)
    a = jax.random.normal(ka, (BATCH, A_DIM), jnp.float32)
    raw_params = make_params(kp, S_DIM, A_DIM)
    packed_params = pack_params(raw_params)

    q1, q2 = critic_forward(x, a, packed_params)
    q1 = jax.block_until_ready(q1)
    q2 = jax.block_until_ready(q2)

    assert q1.shape == (BATCH, 1) and q2.shape == (BATCH, 1)

    # Exact-numerics reference (same bf16 weights / bf16 matmul inputs, f32 acc).
    r1, r2 = critic_reference_packed(x, a, packed_params)
    assert jnp.allclose(q1, r1, atol=1e-3, rtol=1e-3)
    assert jnp.allclose(q2, r2, atol=1e-3, rtol=1e-3)

    # Semantic check against the full-f32 original module (bf16-weight storage
    # introduces a small, bounded difference).
    f1, f2 = critic_reference_f32(x, a, raw_params)
    assert jnp.allclose(q1, f1, atol=5e-2, rtol=5e-2)
    assert jnp.allclose(q2, f2, atol=5e-2, rtol=5e-2)

    print("KERNEL_OK")
</pallas_src>

<mosaic_0001>
module attributes {stable_mosaic.version = 11 : i64} {
  func.func @critic_kernel(%arg0: i32, %arg1: memref<2x8xf32, #tpu.memory_space<vmem>>, %arg2: memref<2x4xf32, #tpu.memory_space<vmem>>, %arg3: memref<8x800xbf16, #tpu.memory_space<vmem>>, %arg4: memref<4x800xbf16, #tpu.memory_space<vmem>>, %arg5: memref<1x800xf32, #tpu.memory_space<vmem>>, %arg6: memref<400x300xbf16, #tpu.memory_space<vmem>>, %arg7: memref<1x300xf32, #tpu.memory_space<vmem>>, %arg8: memref<400x300xbf16, #tpu.memory_space<vmem>>, %arg9: memref<1x300xf32, #tpu.memory_space<vmem>>, %arg10: memref<600x2xbf16, #tpu.memory_space<vmem>>, %arg11: memref<1x2xf32, #tpu.memory_space<vmem>>, %arg12: memref<2x2xf32, #tpu.memory_space<vmem>>) attributes {dimension_semantics = [#tpu.dimension_semantics<parallel>], iteration_bounds = array<i64: 1>, scalar_prefetch = 0 : i64, scratch_operands = 0 : i64, tpu.core_type = #tpu.core_type<tc>, window_params = [{transform_indices = @transform_0, window_bounds = array<i64: 2, 8>}, {transform_indices = @transform_1, window_bounds = array<i64: 2, 4>}, {pipeline_mode = #tpu.pipeline_mode<synchronous>, transform_indices = @transform_2, window_bounds = array<i64: 8, 800>}, {pipeline_mode = #tpu.pipeline_mode<synchronous>, transform_indices = @transform_3, window_bounds = array<i64: 4, 800>}, {pipeline_mode = #tpu.pipeline_mode<synchronous>, transform_indices = @transform_4, window_bounds = array<i64: 1, 800>}, {pipeline_mode = #tpu.pipeline_mode<synchronous>, transform_indices = @transform_5, window_bounds = array<i64: 400, 300>}, {pipeline_mode = #tpu.pipeline_mode<synchronous>, transform_indices = @transform_6, window_bounds = array<i64: 1, 300>}, {pipeline_mode = #tpu.pipeline_mode<synchronous>, transform_indices = @transform_7, window_bounds = array<i64: 400, 300>}, {pipeline_mode = #tpu.pipeline_mode<synchronous>, transform_indices = @transform_8, window_bounds = array<i64: 1, 300>}, {pipeline_mode = #tpu.pipeline_mode<synchronous>, transform_indices = @transform_9, window_bounds = array<i64: 600, 2>}, {pipeline_mode = #tpu.pipeline_mode<synchronous>, transform_indices = @transform_10, window_bounds = array<i64: 1, 2>}, {transform_indices = @transform_11, window_bounds = array<i64: 2, 2>}]} {
    %c0 = arith.constant 0 : index
    %c0_0 = arith.constant 0 : index
    %0 = vector.load %arg1[%c0, %c0_0] : memref<2x8xf32, #tpu.memory_space<vmem>>, vector<2x8xf32>
    %1 = arith.truncf %0 : vector<2x8xf32> to vector<2x8xbf16>
    %c0_1 = arith.constant 0 : index
    %c0_2 = arith.constant 0 : index
    %2 = vector.load %arg2[%c0_1, %c0_2] : memref<2x4xf32, #tpu.memory_space<vmem>>, vector<2x4xf32>
    %3 = arith.truncf %2 : vector<2x4xf32> to vector<2x4xbf16>
    %c0_3 = arith.constant 0 : index
    %c0_4 = arith.constant 0 : index
    %4 = vector.load %arg3[%c0_3, %c0_4] : memref<8x800xbf16, #tpu.memory_space<vmem>>, vector<8x800xbf16>
    %cst = arith.constant dense<0.000000e+00> : vector<2x800xf32>
    %5 = tpu.matmul %1, %4, %cst {dimension_numbers = #tpu.dot_dimension_numbers<[1], [0], [0], [1], [0, 0, 1, 1], [], []>} : vector<2x8xbf16>, vector<8x800xbf16>, vector<2x800xf32> -> vector<2x800xf32>
    %c0_5 = arith.constant 0 : index
    %c0_6 = arith.constant 0 : index
    %6 = vector.load %arg4[%c0_5, %c0_6] : memref<4x800xbf16, #tpu.memory_space<vmem>>, vector<4x800xbf16>
    %cst_7 = arith.constant dense<0.000000e+00> : vector<2x800xf32>
    %7 = tpu.matmul %3, %6, %cst_7 {dimension_numbers = #tpu.dot_dimension_numbers<[1], [0], [0], [1], [0, 0, 1, 1], [], []>} : vector<2x4xbf16>, vector<4x800xbf16>, vector<2x800xf32> -> vector<2x800xf32>
    %8 = arith.addf %5, %7 : vector<2x800xf32>
    %c0_8 = arith.constant 0 : index
    %c0_9 = arith.constant 0 : index
    %9 = vector.load %arg5[%c0_8, %c0_9] : memref<1x800xf32, #tpu.memory_space<vmem>>, vector<1x800xf32>
    %10 = vector.broadcast %9 : vector<1x800xf32> to vector<2x800xf32>
    %11 = arith.addf %8, %10 : vector<2x800xf32>
    %cst_10 = arith.constant 0.000000e+00 : f32
    %12 = vector.broadcast %cst_10 : f32 to vector<2x800xf32>
    %13 = arith.maximumf %11, %12 : vector<2x800xf32>
    %14 = arith.truncf %13 : vector<2x800xf32> to vector<2x800xbf16>
    %15 = vector.extract_strided_slice %14 {offsets = [0, 0], sizes = [2, 400], strides = [1, 1]} : vector<2x800xbf16> to vector<2x400xbf16>
    %c0_11 = arith.constant 0 : index
    %c0_12 = arith.constant 0 : index
    %16 = vector.load %arg6[%c0_11, %c0_12] : memref<400x300xbf16, #tpu.memory_space<vmem>>, vector<400x300xbf16>
    %cst_13 = arith.constant dense<0.000000e+00> : vector<2x300xf32>
    %17 = tpu.matmul %15, %16, %cst_13 {dimension_numbers = #tpu.dot_dimension_numbers<[1], [0], [0], [1], [0, 0, 1, 1], [], []>} : vector<2x400xbf16>, vector<400x300xbf16>, vector<2x300xf32> -> vector<2x300xf32>
    %c0_14 = arith.constant 0 : index
    %c0_15 = arith.constant 0 : index
    %18 = vector.load %arg7[%c0_14, %c0_15] : memref<1x300xf32, #tpu.memory_space<vmem>>, vector<1x300xf32>
    %19 = vector.broadcast %18 : vector<1x300xf32> to vector<2x300xf32>
    %20 = arith.addf %17, %19 : vector<2x300xf32>
    %cst_16 = arith.constant 0.000000e+00 : f32
    %21 = vector.broadcast %cst_16 : f32 to vector<2x300xf32>
    %22 = arith.maximumf %20, %21 : vector<2x300xf32>
    %23 = vector.extract_strided_slice %14 {offsets = [0, 400], sizes = [2, 400], strides = [1, 1]} : vector<2x800xbf16> to vector<2x400xbf16>
    %c0_17 = arith.constant 0 : index
    %c0_18 = arith.constant 0 : index
    %24 = vector.load %arg8[%c0_17, %c0_18] : memref<400x300xbf16, #tpu.memory_space<vmem>>, vector<400x300xbf16>
    %cst_19 = arith.constant dense<0.000000e+00> : vector<2x300xf32>
    %25 = tpu.matmul %23, %24, %cst_19 {dimension_numbers = #tpu.dot_dimension_numbers<[1], [0], [0], [1], [0, 0, 1, 1], [], []>} : vector<2x400xbf16>, vector<400x300xbf16>, vector<2x300xf32> -> vector<2x300xf32>
    %c0_20 = arith.constant 0 : index
    %c0_21 = arith.constant 0 : index
    %26 = vector.load %arg9[%c0_20, %c0_21] : memref<1x300xf32, #tpu.memory_space<vmem>>, vector<1x300xf32>
    %27 = vector.broadcast %26 : vector<1x300xf32> to vector<2x300xf32>
    %28 = arith.addf %25, %27 : vector<2x300xf32>
    %cst_22 = arith.constant 0.000000e+00 : f32
    %29 = vector.broadcast %cst_22 : f32 to vector<2x300xf32>
    %30 = arith.maximumf %28, %29 : vector<2x300xf32>
    %31 = arith.truncf %22 : vector<2x300xf32> to vector<2x300xbf16>
    %32 = arith.truncf %30 : vector<2x300xf32> to vector<2x300xbf16>
    %33 = tpu.concatenate %31, %32 in 1 : vector<2x300xbf16>, vector<2x300xbf16> -> vector<2x600xbf16>
    %c0_23 = arith.constant 0 : index
    %c0_24 = arith.constant 0 : index
    %34 = vector.load %arg10[%c0_23, %c0_24] : memref<600x2xbf16, #tpu.memory_space<vmem>>, vector<600x2xbf16>
    %cst_25 = arith.constant dense<0.000000e+00> : vector<2x2xf32>
    %35 = tpu.matmul %33, %34, %cst_25 {dimension_numbers = #tpu.dot_dimension_numbers<[1], [0], [0], [1], [0, 0, 1, 1], [], []>} : vector<2x600xbf16>, vector<600x2xbf16>, vector<2x2xf32> -> vector<2x2xf32>
    %c0_26 = arith.constant 0 : index
    %c0_27 = arith.constant 0 : index
    %36 = vector.load %arg11[%c0_26, %c0_27] : memref<1x2xf32, #tpu.memory_space<vmem>>, vector<1x2xf32>
    %37 = vector.broadcast %36 : vector<1x2xf32> to vector<2x2xf32>
    %38 = arith.addf %35, %37 : vector<2x2xf32>
    %c0_28 = arith.constant 0 : index
    %c0_29 = arith.constant 0 : index
    %39 = vector.load %arg12[%c0_28, %c0_29] : memref<2x2xf32, #tpu.memory_space<vmem>>, vector<2x2xf32>
    tpu.vector_store %arg12[%c0_28, %c0_29], %38 {strides = array<i32>} : memref<2x2xf32, #tpu.memory_space<vmem>>, vector<2x2xf32>,
    return
  }
  func.func @transform_0(%arg0: i32) -> (i32, i32) {
    %c0_i32 = arith.constant 0 : i32
    %c0_i32_0 = arith.constant 0 : i32
    return %arg0, %c0_i32 : i32, i32
  }
  func.func @transform_1(%arg0: i32) -> (i32, i32) {
    %c0_i32 = arith.constant 0 : i32
    %c0_i32_0 = arith.constant 0 : i32
    return %arg0, %c0_i32 : i32, i32
  }
  func.func @transform_2(%arg0: i32) -> (i32, i32) {
    %c0_i32 = arith.constant 0 : i32
    %c0_i32_0 = arith.constant 0 : i32
    %c0_i32_1 = arith.constant 0 : i32
    return %c0_i32, %c0_i32_0 : i32, i32
  }
  func.func @transform_3(%arg0: i32) -> (i32, i32) {
    %c0_i32 = arith.constant 0 : i32
    %c0_i32_0 = arith.constant 0 : i32
    %c0_i32_1 = arith.constant 0 : i32
    return %c0_i32, %c0_i32_0 : i32, i32
  }
  func.func @transform_4(%arg0: i32) -> (i32, i32) {
    %c0_i32 = arith.constant 0 : i32
    %c0_i32_0 = arith.constant 0 : i32
    %c0_i32_1 = arith.constant 0 : i32
    return %c0_i32, %c0_i32_0 : i32, i32
  }
  func.func @transform_5(%arg0: i32) -> (i32, i32) {
    %c0_i32 = arith.constant 0 : i32
    %c0_i32_0 = arith.constant 0 : i32
    %c0_i32_1 = arith.constant 0 : i32
    return %c0_i32, %c0_i32_0 : i32, i32
  }
  func.func @transform_6(%arg0: i32) -> (i32, i32) {
    %c0_i32 = arith.constant 0 : i32
    %c0_i32_0 = arith.constant 0 : i32
    %c0_i32_1 = arith.constant 0 : i32
    return %c0_i32, %c0_i32_0 : i32, i32
  }
  func.func @transform_7(%arg0: i32) -> (i32, i32) {
    %c0_i32 = arith.constant 0 : i32
    %c0_i32_0 = arith.constant 0 : i32
    %c0_i32_1 = arith.constant 0 : i32
    return %c0_i32, %c0_i32_0 : i32, i32
  }
  func.func @transform_8(%arg0: i32) -> (i32, i32) {
    %c0_i32 = arith.constant 0 : i32
    %c0_i32_0 = arith.constant 0 : i32
    %c0_i32_1 = arith.constant 0 : i32
    return %c0_i32, %c0_i32_0 : i32, i32
  }
  func.func @transform_9(%arg0: i32) -> (i32, i32) {
    %c0_i32 = arith.constant 0 : i32
    %c0_i32_0 = arith.constant 0 : i32
    %c0_i32_1 = arith.constant 0 : i32
    return %c0_i32, %c0_i32_0 : i32, i32
  }
  func.func @transform_10(%arg0: i32) -> (i32, i32) {
    %c0_i32 = arith.constant 0 : i32
    %c0_i32_0 = arith.constant 0 : i32
    %c0_i32_1 = arith.constant 0 : i32
    return %c0_i32, %c0_i32_0 : i32, i32
  }
  func.func @transform_11(%arg0: i32) -> (i32, i32) {
    %c0_i32 = arith.constant 0 : i32
    %c0_i32_0 = arith.constant 0 : i32
    return %arg0, %c0_i32 : i32, i32
  }
}

</mosaic_0001>

<bundles_post_ra>
// kernel: tpu_custom_call.1
= control target key start
LH: loop header
LB: loop body
LE: loop exit
PB: predicated region body
PF: predicated region fallthrough
CT: control target
= control target key end

     0   :  { %16 = vsyncpa [#allocation3], 0  ;;  %s3493_s0 = inlined_call_operand.vmem [shape: f32[2,8], index: 0, kind: input, shape index: {}]   ;;  %s3494_s1 = inlined_call_operand.vmem [shape: f32[2,4], index: 1, kind: input, shape index: {}]   ;;  %s3495_s2 = inlined_call_operand.vmem [shape: bf16[8,800], index: 2, kind: input, shape index: {}]   ;;  %s3496_s3 = inlined_call_operand.vmem [shape: bf16[4,800], index: 3, kind: input, shape index: {}]   ;;  %s3497_s4 = inlined_call_operand.vmem [shape: f32[1,800], index: 4, kind: input, shape index: {}]   ;;  %s3498_s5 = inlined_call_operand.hbm [shape: bf16[400,300], index: 5, kind: input, shape index: {}]   ;;  %s3499_s6 = inlined_call_operand.vmem [shape: f32[1,300], index: 6, kind: input, shape index: {}]   ;;  %s3500_s7 = inlined_call_operand.hbm [shape: bf16[400,300], index: 7, kind: input, shape index: {}]   ;;  %s3501_s8 = inlined_call_operand.vmem [shape: f32[1,300], index: 8, kind: input, shape index: {}]   ;;  %s3502_s9 = inlined_call_operand.vmem [shape: bf16[600,2], index: 9, kind: input, shape index: {}]   ;;  %s3503_s10 = inlined_call_operand.vmem [shape: f32[1,2], index: 10, kind: input, shape index: {}]   ;;  %s3504_s11 = inlined_call_operand.hbm [shape: f32[2,2], index: 11, kind: output, shape index: {}]  }
   0x1   :  { %17 = vsyncpa [#allocation6], 0 }
   0x2   :  { %18 = vsyncpa [#allocation4], 0  ;;  %s3117_s17 = smov [#allocation2]   ;;  %s3045_s21 = scalar_lea.hbm %s3498_s5, 9600 }
   0x3   :  { %s34_s18 = sshll.u32 %s3117_s17, 4  ;;  %p3046_p0 = scmp.ne.s32.totalorder %s3498_s5, %s3045_s21  ;;  %s35_s18 = int_to_ptr.vmem [resolvable:$true] %s34_s18 }
   0x4   :  { %p3049_p1 = scmp.lt.u32.totalorder %s3045_s21, %s3498_s5 }
   0x6   :  { %p3051_p2 = pnand %p3049_p1, %p3046_p0 }
   0x8   :  { %3054 = shalt.err (!%p3051_p2)
}
   0x9   :  { %s3055_s26 = scalar_lea.vmem %s35_s18, 9600  ;;  %p3060_p4 = scmp.lt.s32.totalorder %s35_s18, %s35_s18 }
   0xa   :  { %p3056_p3 = scmp.ne.s32.totalorder %s35_s18, %s3055_s26  ;;  %p3061_p5 = scmp.lt.s32.totalorder %s3055_s26, %s3055_s26 }
   0xc   :  { %p3062_p6 = por %p3061_p5, %p3060_p4 }
   0xe   :  { %p3063_p7 = pnand %p3062_p6, %p3056_p3 }
  0x10   :  { %3066 = shalt.err (!%p3063_p7)
}
  0x11   :  { %s3118_s27 = smov 192   ;;  %s3119_s28 = smov 12  }
  0x12   :  { %40 = dma.hbm_to_vmem [thread:$0]  %s3498_s5, 9600, %s35_s18, [#allocation3], %s3118_s27, %s3118_s27, %s3119_s28  }
  0x13   :  { %s3120_s12 = smov [#allocation5]   ;;  %s3067_s16 = scalar_lea.hbm %s3500_s7, 9600 }
  0x14   :  { %s48_s13 = sshll.u32 %s3120_s12, 4  ;;  %p3068_p8 = scmp.ne.s32.totalorder %s3500_s7, %s3067_s16  ;;  %s49_s13 = int_to_ptr.vmem [resolvable:$true] %s48_s13 }
  0x15   :  { %p3071_p9 = scmp.lt.u32.totalorder %s3067_s16, %s3500_s7 }
  0x17   :  { %p3073_p10 = pnand %p3071_p9, %p3068_p8 }
  0x19   :  { %3076 = shalt.err (!%p3073_p10)
}
  0x1a   :  { %s3077_s22 = scalar_lea.vmem %s49_s13, 9600  ;;  %p3082_p12 = scmp.lt.s32.totalorder %s49_s13, %s49_s13 }
  0x1b   :  { %p3078_p11 = scmp.ne.s32.totalorder %s49_s13, %s3077_s22  ;;  %p3083_p13 = scmp.lt.s32.totalorder %s3077_s22, %s3077_s22 }
  0x1d   :  { %p3084_p0 = por %p3083_p13, %p3082_p12 }
  0x1f   :  { %p3085_p1 = pnand %p3084_p0, %p3078_p11 }
  0x21   :  { %3088 = shalt.err (!%p3085_p1)
}
  0x22   :  { %54 = dma.hbm_to_vmem [thread:$0]  %s3500_s7, 9600, %s49_s13, [#allocation6], %s3118_s27, %s3118_s27, %s3119_s28  }
  0x23   :  { %3111 = dma.done.wait [#allocation3], 9600  }
  0x24   :  { %3112 = vsyncadd [#allocation3], 4294957696 }
  0x25   :  { %3113 = dma.done.wait [#allocation6], 9600  }
  0x26   :  { %3114 = vsyncadd [#allocation6], 4294957696  ;;  %v84_v0 = vlaneseq  ;;  %v3121_v1 = vmov 1983009808   ;;  %v3122_v3 = vmov 0   ;;  %v76_v7 = vld [vmem:[%s3496_s3] sm:$0xff] }
  0x27   :  { %v82_v2 = vunpack.c.l.s4 %v3121_v1  ;;  %171 = vmatprep.mubr.bf16.mxu1 %v3122_v3  ;;  %253 = vmatprep.mubr.bf16.mxu0 %v3122_v3  ;;  %vm117_vm0 = vcmask 1041408   ;;  %v77_v8 = vld [vmem:[%s3496_s3 + $0x8] sm:$0x3f]  ;;  %v80_v9 = vcombine.high %v76_v7, %v76_v7  ;;  %v72_v12 = vld [vmem:[%s3495_s2] sm:$0xff]  ;;  %vm324_vm1 = vcmask 1043456   ;;  %v74_v23 = vld [vmem:[%s3495_s2 + $0x10] sm:$0xff] }
  0x28   :  { %v3214_v4 = vshrl.u32 %v84_v0, 7  ;;  %v70_v13 = vld [vmem:[%s3494_s1] sm:$0x3]  ;;  %v2441_v14 = vcombine.high %v72_v12, %v72_v12  ;;  %v2440_v15 = vcombine.low %v72_v12, %v72_v12  ;;  %vm113_vm2 = vcmask 31744   ;;  %v73_v33 = vld [vmem:[%s3495_s2 + $0x8] sm:$0xff]  ;;  %s3127_s19 = smov [#allocation7]  }
  0x29   :  { %v83_v5 = vunpack.c.0.s8 %v82_v2  ;;  %v71_v21 = vpack.c.bf16 %v70_v13, %v70_v13  ;;  %v97_v24 = vcombine.high %v77_v8, %v77_v8  ;;  %v2445_v27 = vcombine.high %v74_v23, %v74_v23  ;;  %v68_v28 = vld [vmem:[%s3493_s0] sm:$0x3]  ;;  %v2809_v37 = vld [vmem:[#allocation2 + $0x4] ss:$12 sps:$4 sm:$0xff]   ;;  %v2812_v41 = vld [vmem:[#allocation2 + $0x1c] ss:$12 sps:$4 sm:$0xff]  }
  0x2a   :  { %v326_v26 = vsel %vm324_vm1, %v2440_v15, 0  ;;  %v2444_v30 = vcombine.low %v74_v23, %v74_v23  ;;  %v3123_v31 = vmov 0.0   ;;  %v69_v32 = vpack.c.bf16 %v68_v28, %v68_v28  ;;  %v2807_v40 = vld [vmem:[#allocation2] ss:$12 sps:$4 sm:$0xff]   ;;  %v2806_v42 = vld [vmem:[%s3495_s2 + $0x18] ss:$0 sps:$4 sm:$0xff]  }
  0x2b   :  { %v86_v6 = vsub.s32 %v83_v5, %v3214_v4  ;;  %vm320_vm3 = vcmask 64512   ;;  %v2443_v36 = vcombine.high %v73_v33, %v73_v33  ;;  %vm3124_vm4 = vmmov 0   ;;  %v2810_v43 = vld [vmem:[#allocation2 + $0x18] ss:$12 sps:$4 sm:$0xff]   ;;  %v2815_v44 = vld [vmem:[#allocation2 + $0x34] ss:$12 sps:$4 sm:$0xff]  }
  0x2c   :  { %v338_v35 = vsel %vm324_vm1, %v2444_v30, 0  ;;  %v2442_v38 = vcombine.low %v73_v33, %v73_v33  ;;  %v2813_v45 = vld [vmem:[#allocation2 + $0x30] ss:$12 sps:$4 sm:$0xff]   ;;  %v2834_v46 = vld [vmem:[#allocation2 + $0xc8] ss:$12 sps:$4 sm:$0xff]   ;;  %v344_v48 = vsel %vm324_vm1, %v2806_v42, 0 }
  0x2d   :  { %v87_v10 = vrot.slane %v76_v7, %v86_v6  ;;  %v104_v11 = vrot.slane %v77_v8, %v86_v6  ;;  %v94_v16 = vrot.slane %v80_v9, %v86_v6  ;;  %v111_v29 = vrot.slane %v97_v24, %v86_v6  ;;  %v2818_v47 = vld [vmem:[#allocation2 + $0x4c] ss:$12 sps:$4 sm:$0xff]   ;;  %v2816_v49 = vld [vmem:[#allocation2 + $0x48] ss:$12 sps:$4 sm:$0xff]   ;;  %v2821_v50 = vld [vmem:[#allocation2 + $0x64] ss:$12 sps:$4 sm:$0xff]  }
  0x2e   :  { %v332_v39 = vsel %vm324_vm1, %v2442_v38, 0  ;;  %v2835_v51 = vld [vmem:[#allocation2 + $0x8] ss:$12 sps:$4 sm:$0xff]   ;;  %v2819_v52 = vld [vmem:[#allocation2 + $0x60] ss:$12 sps:$4 sm:$0xff]   ;;  %vm1084_vm5 = vcmask 130048  }
  0x2f   :  { %v95_v17 = vcombine.high %v87_v10, %v87_v10  ;;  %v112_v18 = vcombine.high %v104_v11, %v104_v11  ;;  %v119_v19 = vsel %vm117_vm0, %v87_v10, 0  ;;  %v131_v20 = vsel %vm117_vm0, %v104_v11, 0  ;;  %v2839_v53 = vld [vmem:[#allocation2 + $0xe0] ss:$12 sps:$4 sm:$0xff]   ;;  %v2824_v54 = vld [vmem:[#allocation2 + $0x7c] ss:$12 sps:$4 sm:$0xff]  }
  0x30   :  { %v96_v22 = vcombine.high %v94_v16, %v94_v16  ;;  %v125_v25 = vsel %vm117_vm0, %v94_v16, 0  ;;  %v137_v34 = vsel %vm117_vm0, %v111_v29, 0  ;;  %v2840_v55 = vld [vmem:[#allocation2 + $0x20] ss:$12 sps:$4 sm:$0xff]   ;;  %v2822_v56 = vld [vmem:[#allocation2 + $0x78] ss:$12 sps:$4 sm:$0xff]  }
  0x31   :  { %2433 = vmatprep.subr.msk.bf16.mxu1 %vm117_vm0, %v95_v17  ;;  %2437 = vmatprep.subr.msk.bf16.mxu0 %vm117_vm0, %v112_v18  ;;  %v2844_v57 = vld [vmem:[#allocation2 + $0xf8] ss:$12 sps:$4 sm:$0xff]   ;;  %v2827_v58 = vld [vmem:[#allocation2 + $0x94] ss:$12 sps:$4 sm:$0xff]   ;;  %v2825_v60 = vld [vmem:[#allocation2 + $0x90] ss:$12 sps:$4 sm:$0xff]  }
  0x32   :  { %140 = vmatpush1.bf16.msra.mxu1 %v119_v19  ;;  %222 = vmatpush1.bf16.msra.mxu0 %v131_v20  ;;  %v2845_v59 = vld [vmem:[#allocation2 + $0x38] ss:$12 sps:$4 sm:$0xff]   ;;  %v2849_v61 = vld [vmem:[#allocation2 + $0x110] ss:$12 sps:$4 sm:$0xff]   ;;  %v2828_v0 = vld [vmem:[#allocation2 + $0xa8] ss:$12 sps:$4 sm:$0xff]  }
  0x33   :  { %2435 = vmatprep.subr.msk.bf16.mxu1 %vm117_vm0, %v96_v22  ;;  %2447 = vmatprep.subr.msk.bf16.mxu0 %vm324_vm1, %v2441_v14  ;;  %v2830_v62 = vld [vmem:[#allocation2 + $0xac] ss:$12 sps:$4 sm:$0xff]   ;;  %v2850_v63 = vld [vmem:[#allocation2 + $0x50] ss:$12 sps:$4 sm:$0xff]   ;;  %v2843_v7 = vld [vmem:[#allocation2 + $0xf4] ss:$12 sps:$4 sm:$0xff]  }
  0x34   :  { %v2833_v1 = vld [vmem:[#allocation2 + $0xc4] ss:$12 sps:$4 sm:$0xff]   ;;  %v2831_v2 = vld [vmem:[#allocation2 + $0xc0] ss:$12 sps:$4 sm:$0xff]   ;;  %v2838_v5 = vld [vmem:[#allocation2 + $0xdc] ss:$12 sps:$4 sm:$0xff]  }
  0x35   :  { %2434 = vmatmul.mubr.msk.bf16.vlgmr.msra.gmra.mrb[0].mxu1 %vm113_vm2, %v71_v21  ;;  %2438 = vmatmul.mubr.msk.bf16.vlgmr.msra.gmra.mrb[0].mxu0 %vm113_vm2, %v71_v21  ;;  %v2836_v6 = vld [vmem:[#allocation2 + $0xd8] ss:$12 sps:$4 sm:$0xff]   ;;  %v2841_v8 = vld [vmem:[#allocation2 + $0xf0] ss:$12 sps:$4 sm:$0xff]   ;;  %v2846_v10 = vld [vmem:[#allocation2 + $0x108] ss:$12 sps:$4 sm:$0xff]  }
  0x36   :  { %181 = vmatpush1.bf16.msra.mxu1 %v125_v25  ;;  %347 = vmatpush1.bf16.msra.mxu0 %v326_v26  ;;  %v2848_v9 = vld [vmem:[#allocation2 + $0x10c] ss:$12 sps:$4 sm:$0xff]   ;;  %v2853_v11 = vld [vmem:[#allocation2 + $0x124] ss:$12 sps:$4 sm:$0xff]   ;;  %v2854_v12 = vld [vmem:[#allocation2 + $0x128] ss:$12 sps:$4 sm:$0xff]  }
  0x37   :  { %212 = vmatprep.mubr.bf16.mxu1 %v3122_v3  ;;  %378 = vmatprep.mubr.bf16.mxu0 %v3122_v3  ;;  %v2851_v13 = vld [vmem:[#allocation2 + $0x120] ss:$12 sps:$4 sm:$0xff]   ;;  %v2855_v14 = vld [vmem:[#allocation2 + $0x68] ss:$12 sps:$4 sm:$0xff]   ;;  %v2856_v15 = vld [vmem:[#allocation2 + $0x138] ss:$12 sps:$4 sm:$0xff]  }
  0x38   :  { %2747 = vmatprep.subr.bf16.mxu1 %v3123_v31  ;;  %2451 = vmatprep.subr.msk.bf16.mxu0 %vm324_vm1, %v2445_v27  ;;  %v2858_v16 = vld [vmem:[#allocation2 + $0x13c] ss:$12 sps:$4 sm:$0xff]   ;;  %v2859_v17 = vld [vmem:[#allocation2 + $0x140] ss:$12 sps:$4 sm:$0xff]   ;;  %v2865_v22 = vld [vmem:[#allocation2 + $0x98] ss:$12 sps:$4 sm:$0xff]  }
  0x39   :  { %v2860_v18 = vld [vmem:[#allocation2 + $0x80] ss:$12 sps:$4 sm:$0xff]   ;;  %v2861_v20 = vld [vmem:[#allocation2 + $0x150] ss:$12 sps:$4 sm:$0xff]   ;;  %v2866_v25 = vld [vmem:[#allocation2 + $0x168] ss:$12 sps:$4 sm:$0xff]  }
  0x3a   :  { %v2863_v19 = vld [vmem:[#allocation2 + $0x154] ss:$12 sps:$4 sm:$0xff]   ;;  %v2868_v23 = vld [vmem:[#allocation2 + $0x16c] ss:$12 sps:$4 sm:$0xff]   ;;  %v2869_v24 = vld [vmem:[#allocation2 + $0x170] ss:$12 sps:$4 sm:$0xff]  }
  0x3b   :  { %v2870_v26 = vld [vmem:[#allocation2 + $0xb0] ss:$12 sps:$4 sm:$0xff]   ;;  %v3280_v38 = vld [vmem:[%s3497_s4] sm:$0x7f]  ;;  %s3125_s4 = smov 112   ;;  %vm1382_vm6 = vcmask 916480  }
  0x3c   :  { %v2873_v27 = vld [vmem:[#allocation2 + $0x184] ss:$12 sps:$4 sm:$0xff]   ;;  %vm1972_vm7 = vcmask 359424   ;;  %vm2288_vm8 = vcmask 719872   ;;  %s2423_s20 = sshll.u32 %s3127_s19, 4  ;;  %vm2415_vm9 = vcmask 9216   ;;  %s2424_s20 = int_to_ptr.vmem [resolvable:$true] %s2423_s20 }
  0x3d   :  { %2436 = vmatmul.mubr.msk.bf16.vlgmr.msra.gmra.mrb[4].mxu1 %vm113_vm2, %v71_v21  ;;  %2448 = vmatmul.mubr.msk.bf16.vlgmr.msra.gmra.mrb[4].mxu0 %vm320_vm3, %v69_v32  ;;  %s3089_s21 = scalar_lea.vmem %s2424_s20, 32  ;;  %p3094_p3 = scmp.lt.s32.totalorder %s2424_s20, %s2424_s20 }
  0x3e   :  { %2748 = vmatpush3.bf16.msra.mxu1 %v137_v34  ;;  %429 = vmatpush1.bf16.msra.mxu0 %v338_v35  ;;  %p3090_p2 = scmp.ne.s32.totalorder %s2424_s20, %s3089_s21  ;;  %p3095_p4 = scmp.lt.s32.totalorder %s3089_s21, %s3089_s21 }
  0x3f   :  { %2749 = vmatprep.mubr.msk.bf16.mxu1 %vm3124_vm4, %v3123_v31  ;;  %460 = vmatprep.mubr.bf16.mxu0 %v3122_v3 }
  0x40   :  { %2449 = vmatprep.subr.msk.bf16.mxu1 %vm324_vm1, %v2443_v36  ;;  %1088 = vmatprep.subr.bf16.mxu0 %v2809_v37  ;;  %v3275_v37 = vsub.s32 0, %v3214_v4  ;;  %p3096_p5 = por %p3095_p4, %p3094_p3 }
  0x42   :  { %p3097_p6 = pnand %p3096_p5, %p3090_p2 }
  0x45   :  { %2750 = vmatmul.mubr.msk.bf16.vlgmr.msra.gmra.mrb[8].mxu1 %vm113_vm2, %v71_v21  ;;  %2452 = vmatmul.mubr.msk.bf16.vlgmr.msra.gmra.mrb[8].mxu0 %vm320_vm3, %v69_v32  ;;  %v2864_v21 = vld [vmem:[#allocation2 + $0x158] ss:$12 sps:$4 sm:$0xff]  }
  0x46   :  { %388 = vmatpush1.bf16.msra.mxu1 %v332_v39  ;;  %419 = vmatprep.mubr.bf16.mxu1 %v3122_v3  ;;  %v3283_v39 = vsub.s32 1, %v3214_v4 }
  0x47   :  { %2753 = vmatprep.subr.bf16.mxu1 %v3123_v31  ;;  %1089 = vmatpush1.bf16.msra.mxu0 %v2807_v40  ;;  %v514_v40 = vrot.slane %v3280_v38, %v3275_v37 }
  0x48   :  { %1090 = vmatprep.subr.bf16.mxu0 %v2812_v41 }
  0x4b   :  { %1091 = vmatpush1.bf16.msra.mxu0 %v2810_v43  ;;  %v518_v43 = vrot.slane %v3280_v38, %v3283_v39 }
  0x4c   :  { %1092 = vmatprep.subr.bf16.mxu0 %v2815_v44 }
  0x4d   :  { %2450 = vmatmul.mubr.msk.bf16.vlgmr.msra.gmra.mrb[12].mxu1 %vm320_vm3, %v69_v32 }
  0x4e   :  { %2754 = vmatpush3.bf16.msra.mxu1 %v344_v48  ;;  %2755 = vmatprep.mubr.msk.bf16.mxu1 %vm3124_vm4, %v3123_v31 }
  0x4f   :  { %1093 = vmatpush1.bf16.msra.mxu0 %v2813_v45  ;;  %2652 = vmatprep.subr.bf16.mxu1 %v2834_v46 }
  0x50   :  { %1094 = vmatprep.subr.bf16.mxu0 %v2818_v47 }
  0x53   :  { %1095 = vmatpush1.bf16.msra.mxu0 %v2816_v49 }
  0x54   :  { %1096 = vmatprep.subr.bf16.mxu0 %v2821_v50 }
  0x55   :  { %2756 = vmatmul.mubr.msk.bf16.vlgmr.msra.gmra.mrb[16].mxu1 %vm320_vm3, %v69_v32 }
  0x56   :  { %2653 = vmatpush3.bf16.msra.mxu1 %v2835_v51 }
  0x57   :  { %1097 = vmatpush1.bf16.msra.mxu0 %v2819_v52  ;;  %2654 = vmatprep.subr.bf16.mxu1 %v2839_v53  ;;  %v529_v53 = vsub.s32 4, %v3214_v4 }
  0x58   :  { %1098 = vmatprep.subr.bf16.mxu0 %v2824_v54 }
  0x5a   :  { %2655 = vmatpush3.bf16.msra.mxu1 %v2840_v55  ;;  %v533_v55 = vsub.s32 5, %v3214_v4 }
  0x5b   :  { %1099 = vmatpush1.bf16.msra.mxu0 %v2822_v56  ;;  %2656 = vmatprep.subr.bf16.mxu1 %v2844_v57 }
  0x5c   :  { %1100 = vmatprep.subr.bf16.mxu0 %v2827_v58  ;;  %v530_v58 = vrot.slane %v3280_v38, %v529_v53 }
  0x5e   :  { %2657 = vmatpush3.bf16.msra.mxu1 %v2845_v59 }
  0x5f   :  { %1101 = vmatpush1.bf16.msra.mxu0 %v2825_v60  ;;  %2658 = vmatprep.subr.bf16.mxu1 %v2849_v61 }
  0x60   :  { %1102 = vmatprep.subr.bf16.mxu0 %v2830_v62  ;;  %v534_v62 = vrot.slane %v3280_v38, %v533_v55  ;;  %v2894_v55 = vld [vmem:[#allocation2 + $0x200] ss:$12 sps:$4 sm:$0xff]  }
  0x62   :  { %2659 = vmatpush3.bf16.msra.mxu1 %v2850_v63  ;;  %v2871_v63 = vld [vmem:[#allocation2 + $0x180] ss:$12 sps:$4 sm:$0xff]  }
  0x63   :  { %1103 = vmatpush1.bf16.msra.mxu0 %v2828_v0  ;;  %2660 = vmatprep.subr.bf16.mxu1 %v2854_v12  ;;  %v2874_v0 = vld [vmem:[#allocation2 + $0x188] ss:$12 sps:$4 sm:$0xff]  }
  0x64   :  { %1104 = vmatprep.subr.bf16.mxu0 %v2833_v1 }
  0x66   :  { %2661 = vmatpush3.bf16.msra.mxu1 %v2855_v14 }
  0x67   :  { %1105 = vmatpush1.bf16.msra.mxu0 %v2831_v2  ;;  %2662 = vmatprep.subr.bf16.mxu1 %v2859_v17  ;;  %v525_v17 = vsub.s32 3, %v3214_v4 }
  0x68   :  { %1106 = vmatprep.subr.bf16.mxu0 %v2838_v5 }
  0x6a   :  { %2663 = vmatpush3.bf16.msra.mxu1 %v2860_v18 }
  0x6b   :  { %1107 = vmatpush1.bf16.msra.mxu0 %v2836_v6  ;;  %2664 = vmatprep.subr.bf16.mxu1 %v2864_v21 }
  0x6c   :  { %1108 = vmatprep.subr.bf16.mxu0 %v2843_v7  ;;  %v2877_v7 = vld [vmem:[#allocation2 + $0x19c] ss:$12 sps:$4 sm:$0xff]  }
  0x6e   :  { %2665 = vmatpush3.bf16.msra.mxu1 %v2865_v22 }
  0x6f   :  { %1109 = vmatpush1.bf16.msra.mxu0 %v2841_v8  ;;  %2666 = vmatprep.subr.bf16.mxu1 %v2869_v24  ;;  %v2879_v24 = vld [vmem:[#allocation2 + $0x1b0] ss:$12 sps:$4 sm:$0xff]  }
  0x70   :  { %1110 = vmatprep.subr.bf16.mxu0 %v2848_v9 }
  0x72   :  { %2667 = vmatpush3.bf16.msra.mxu1 %v2870_v26 }
  0x73   :  { %1111 = vmatpush1.bf16.msra.mxu0 %v2846_v10  ;;  %1210 = vmatprep.subr.bf16.mxu1 %v3122_v3 }
  0x74   :  { %1112 = vmatprep.subr.bf16.mxu0 %v2853_v11 }
  0x77   :  { %1113 = vmatpush1.bf16.msra.mxu0 %v2851_v13 }
  0x78   :  { %1114 = vmatprep.subr.bf16.mxu0 %v2858_v16  ;;  %v2878_v16 = vld [vmem:[#allocation2 + $0x1a0] ss:$12 sps:$4 sm:$0xff]  }
  0x7b   :  { %1115 = vmatpush1.bf16.msra.mxu0 %v2856_v15  ;;  %v2875_v15 = vld [vmem:[#allocation2 + $0x198] ss:$12 sps:$4 sm:$0xff]  }
  0x7c   :  { %1116 = vmatprep.subr.bf16.mxu0 %v2863_v19  ;;  %v2881_v19 = vld [vmem:[#allocation2 + $0x1b4] ss:$12 sps:$4 sm:$0xff]  }
  0x7f   :  { %1117 = vmatpush1.bf16.msra.mxu0 %v2861_v20 }
  0x80   :  { %1118 = vmatprep.subr.bf16.mxu0 %v2868_v23  ;;  %v526_v23 = vrot.slane %v3280_v38, %v525_v17  ;;  %v2944_v17 = vld [vmem:[#allocation5 + $0xf8] ss:$12 sps:$4 sm:$0xff]  }
  0x83   :  { %1119 = vmatpush1.bf16.msra.mxu0 %v2866_v25  ;;  %v2882_v25 = vld [vmem:[#allocation2 + $0x1b8] ss:$12 sps:$4 sm:$0xff]  }
  0x84   :  { %1129 = vmatprep.subr.bf16.mxu0 %v2873_v27 }
 0x108   :  { %v173_v28 = vpop.f32.mrb[0].mxu1  ;;  %v255_v29 = vpop.f32.mrb[0].mxu0 }
 0x109   :  { %v175_v30 = vpop.f32.mrb[1].mxu1  ;;  %v257_v32 = vpop.f32.mrb[1].mxu0 }
 0x10a   :  { %v177_v33 = vpop.f32.mrb[2].mxu1  ;;  %v259_v34 = vpop.f32.mrb[2].mxu0 }
 0x10b   :  { %v178_v35 = vpop.f32.mrb[3].mxu1  ;;  %v260_v36 = vpop.f32.mrb[3].mxu0  ;;  %v537_v34 = vsub.s32 6, %v3214_v4 }
 0x10c   :  { %v2883_v36 = vld [vmem:[#allocation2 + $0x1c8] ss:$12 sps:$4 sm:$0xff]  }
 0x110   :  { %v214_v41 = vpop.f32.mrb[4].mxu1  ;;  %v380_v42 = vpop.f32.mrb[4].mxu0 }
 0x111   :  { %v381_v44 = vadd.f32 %v380_v42, %v173_v28  ;;  %v216_v45 = vpop.f32.mrb[5].mxu1  ;;  %v382_v46 = vpop.f32.mrb[5].mxu0  ;;  %v2885_v28 = vld [vmem:[#allocation2 + $0x1cc] ss:$12 sps:$4 sm:$0xff]  }
 0x112   :  { %v383_v47 = vadd.f32 %v382_v46, %v175_v30  ;;  %v218_v48 = vpop.f32.mrb[6].mxu1  ;;  %v384_v49 = vpop.f32.mrb[6].mxu0  ;;  %v2887_v46 = vld [vmem:[#allocation2 + $0x1e0] ss:$12 sps:$4 sm:$0xff]  }
 0x113   :  { %v546_v50 = vadd.f32 %v514_v40, %v381_v44  ;;  %v219_v51 = vpop.f32.mrb[7].mxu1  ;;  %v385_v52 = vpop.f32.mrb[7].mxu0  ;;  %v2886_v40 = vld [vmem:[#allocation2 + $0x1d0] ss:$12 sps:$4 sm:$0xff]  }
 0x114   :  { %v547_v54 = vadd.f32 %v518_v43, %v383_v47  ;;  %v538_v43 = vrot.slane %v3280_v38, %v537_v34  ;;  %v2890_v47 = vld [vmem:[#allocation2 + $0x1e8] ss:$12 sps:$4 sm:$0xff]   ;;  %v2964_v34 = vld [vmem:[#allocation5 + $0x158] ss:$12 sps:$4 sm:$0xff]  }
 0x115   :  { %v553_v56 = vmax.f32 %v546_v50, 0.0  ;;  %v2893_v49 = vld [vmem:[#allocation2 + $0x1fc] ss:$12 sps:$4 sm:$0xff]  }
 0x116   :  { %v554_v57 = vmax.f32 %v547_v54, 0.0  ;;  %v2891_v54 = vld [vmem:[#allocation2 + $0x1f8] ss:$12 sps:$4 sm:$0xff]  }
 0x117   :  { %v560_v1 = vpack.c.bf16 %v553_v56, %v553_v56  ;;  %v3312_v56 = vsub.s32 2, %v3214_v4  ;;  %v2899_v4 = vld [vmem:[#allocation2 + $0x228] ss:$12 sps:$4 sm:$0xff]  }
 0x118   :  { %v561_v59 = vpack.c.bf16 %v554_v57, %v554_v57  ;;  %v3292_v60 = vpop.f32.mrb[8].mxu1  ;;  %v462_v61 = vpop.f32.mrb[8].mxu0 }
 0x119   :  { %v463_v2 = vadd.f32 %v462_v61, %v255_v29  ;;  %v2751_v5 = vpop.f32.mrb[9].mxu1  ;;  %v464_v6 = vpop.f32.mrb[9].mxu0  ;;  %v2898_v61 = vld [vmem:[#allocation2 + $0x218] ss:$12 sps:$4 sm:$0xff]  }
 0x11a   :  { %v465_v8 = vadd.f32 %v464_v6, %v257_v32  ;;  %v299_v9 = vpop.f32.mrb[10].mxu1  ;;  %1120 = vmatprep.mubr.bf16.mxu0 %v561_v59  ;;  %1202 = vmatprep.mubr.bf16.mxu1 %v561_v59  ;;  %v466_v10 = vpop.f32.mrb[10].mxu0  ;;  %v2903_v5 = vld [vmem:[#allocation2 + $0x240] ss:$12 sps:$4 sm:$0xff]  }
 0x11b   :  { %v2752_v11 = vpop.f32.mrb[11].mxu1  ;;  %1121 = vmatmul.mubr.bf16.vlgmr.msra.gmra.mrb[12].mxu0 %v560_v1  ;;  %1203 = vmatmul.mubr.bf16.vlgmr.msra.gmra.mrb[20].mxu1 %v560_v1  ;;  %v467_v12 = vpop.f32.mrb[11].mxu0  ;;  %v550_v13 = vadd.f32 %v530_v58, %v463_v2  ;;  %v2897_v58 = vld [vmem:[#allocation2 + $0x214] ss:$12 sps:$4 sm:$0xff]   ;;  %v2905_v2 = vld [vmem:[#allocation2 + $0x244] ss:$12 sps:$4 sm:$0xff]  }
 0x11c   :  { %v551_v14 = vadd.f32 %v534_v62, %v465_v8  ;;  %1130 = vmatpush1.bf16.msra.mxu0 %v2871_v63  ;;  %1211 = vmatpush1.bf16.msra.mxu1 %v2874_v0  ;;  %v522_v62 = vrot.slane %v3280_v38, %v3312_v56  ;;  %v2901_v63 = vld [vmem:[#allocation2 + $0x22c] ss:$12 sps:$4 sm:$0xff]   ;;  %v2902_v0 = vld [vmem:[#allocation2 + $0x230] ss:$12 sps:$4 sm:$0xff]   ;;  %v2906_v38 = vld [vmem:[#allocation2 + $0x248] ss:$12 sps:$4 sm:$0xff]  }
 0x11d   :  { %1131 = vmatprep.subr.bf16.mxu0 %v2877_v7  ;;  %1212 = vmatprep.subr.bf16.mxu1 %v3122_v3  ;;  %v557_v18 = vmax.f32 %v550_v13, 0.0  ;;  %v2909_v7 = vld [vmem:[#allocation5 + $0x4] ss:$12 sps:$4 sm:$0xff]   ;;  %v2934_v8 = vld [vmem:[#allocation5 + $0xc8] ss:$12 sps:$4 sm:$0xff]  }
 0x11e   :  { %v558_v20 = vmax.f32 %v551_v14, 0.0  ;;  %v2907_v9 = vld [vmem:[#allocation5] ss:$12 sps:$4 sm:$0xff]   ;;  %v2935_v10 = vld [vmem:[#allocation5 + $0x8] ss:$12 sps:$4 sm:$0xff]  }
 0x11f   :  { %v564_v21 = vpack.c.bf16 %v557_v18, %v557_v18  ;;  %v2912_v12 = vld [vmem:[#allocation5 + $0x1c] ss:$12 sps:$4 sm:$0xff]   ;;  %v2939_v13 = vld [vmem:[#allocation5 + $0xe0] ss:$12 sps:$4 sm:$0xff]   ;;  %v2910_v14 = vld [vmem:[#allocation5 + $0x18] ss:$12 sps:$4 sm:$0xff]  }
 0x120   :  { %1132 = vmatpush1.bf16.msra.mxu0 %v2875_v15  ;;  %1213 = vmatpush1.bf16.msra.mxu1 %v2878_v16  ;;  %v421_v22 = vpop.f32.mrb[12].mxu1  ;;  %v565_v32 = vpack.c.bf16 %v558_v20, %v558_v20  ;;  %v2940_v15 = vld [vmem:[#allocation5 + $0x20] ss:$12 sps:$4 sm:$0xff]   ;;  %v2913_v18 = vld [vmem:[#allocation5 + $0x30] ss:$12 sps:$4 sm:$0xff]  }
 0x121   :  { %v3298_v26 = vadd.f32 %v421_v22, %v214_v41  ;;  %v423_v27 = vpop.f32.mrb[13].mxu1  ;;  %1376 = vrot.lane.b32.xlu0 %v564_v21, %s3125_s4  ;;  %1133 = vmatprep.subr.bf16.mxu0 %v2881_v19  ;;  %v2889_v41 = vld [vmem:[#allocation2 + $0x1e4] ss:$12 sps:$4 sm:$0xff]   ;;  %v2915_v16 = vld [vmem:[#allocation5 + $0x34] ss:$12 sps:$4 sm:$0xff]  }
 0x122   :  { %v424_v29 = vadd.f32 %v423_v27, %v216_v45  ;;  %v425_v30 = vpop.f32.mrb[14].mxu1  ;;  %1214 = vmatprep.subr.bf16.mxu1 %v3122_v3  ;;  %v2945_v19 = vld [vmem:[#allocation5 + $0x38] ss:$12 sps:$4 sm:$0xff]   ;;  %v2949_v21 = vld [vmem:[#allocation5 + $0x110] ss:$12 sps:$4 sm:$0xff]  }
 0x123   :  { %v426_v33 = vpop.f32.mrb[15].mxu1  ;;  %v548_v1 = vadd.f32 %v522_v62, %v3298_v26  ;;  %v2918_v20 = vld [vmem:[#allocation5 + $0x4c] ss:$12 sps:$4 sm:$0xff]   ;;  %v2916_v22 = vld [vmem:[#allocation5 + $0x48] ss:$12 sps:$4 sm:$0xff]  }
 0x124   :  { %v549_v35 = vadd.f32 %v526_v23, %v424_v29  ;;  %1134 = vmatpush1.bf16.msra.mxu0 %v2879_v24  ;;  %1215 = vmatpush1.bf16.msra.mxu1 %v2882_v25  ;;  %v2950_v23 = vld [vmem:[#allocation5 + $0x50] ss:$12 sps:$4 sm:$0xff]   ;;  %v2954_v25 = vld [vmem:[#allocation5 + $0x128] ss:$12 sps:$4 sm:$0xff]   ;;  %v2919_v26 = vld [vmem:[#allocation5 + $0x60] ss:$12 sps:$4 sm:$0xff]  }
 0x125   :  { %1378 = vrot.lane.b32.xlu0 %v565_v32, %s3125_s4  ;;  %1135 = vmatprep.subr.bf16.mxu0 %v2885_v28  ;;  %v555_v6 = vmax.f32 %v548_v1, 0.0  ;;  %v2921_v24 = vld [vmem:[#allocation5 + $0x64] ss:$12 sps:$4 sm:$0xff]   ;;  %v2955_v27 = vld [vmem:[#allocation5 + $0x68] ss:$12 sps:$4 sm:$0xff]  }
 0x126   :  { %v556_v42 = vmax.f32 %v549_v35, 0.0  ;;  %1216 = vmatprep.subr.bf16.mxu1 %v3122_v3  ;;  %v2924_v28 = vld [vmem:[#allocation5 + $0x7c] ss:$12 sps:$4 sm:$0xff]   ;;  %v2959_v29 = vld [vmem:[#allocation5 + $0x140] ss:$12 sps:$4 sm:$0xff]  }
 0x127   :  { %v562_v11 = vpack.c.bf16 %v555_v6, %v555_v6  ;;  %v2922_v30 = vld [vmem:[#allocation5 + $0x78] ss:$12 sps:$4 sm:$0xff]   ;;  %v2960_v32 = vld [vmem:[#allocation5 + $0x80] ss:$12 sps:$4 sm:$0xff]   ;;  %v2925_v35 = vld [vmem:[#allocation5 + $0x90] ss:$12 sps:$4 sm:$0xff]  }
 0x128   :  { %v563_v44 = vpack.c.bf16 %v556_v42, %v556_v42  ;;  %1136 = vmatpush1.bf16.msra.mxu0 %v2883_v36  ;;  %1217 = vmatpush1.bf16.msra.mxu1 %v2886_v40  ;;  %v503_v45 = vpop.f32.mrb[16].mxu1  ;;  %v2927_v33 = vld [vmem:[#allocation5 + $0x94] ss:$12 sps:$4 sm:$0xff]   ;;  %v2965_v36 = vld [vmem:[#allocation5 + $0x98] ss:$12 sps:$4 sm:$0xff]  }
 0x129   :  { %v504_v48 = vadd.f32 %v503_v45, %v3292_v60  ;;  %1137 = vmatprep.subr.bf16.mxu0 %v2889_v41  ;;  %1218 = vmatprep.subr.bf16.mxu1 %v3122_v3  ;;  %v2757_v50 = vpop.f32.mrb[17].mxu1  ;;  %v2895_v60 = vld [vmem:[#allocation2 + $0x210] ss:$12 sps:$4 sm:$0xff]   ;;  %v2969_v41 = vld [vmem:[#allocation5 + $0x170] ss:$12 sps:$4 sm:$0xff]  }
 0x12a   :  { %1374 = vrot.lane.b32.xlu1 %v563_v44, %s3125_s4  ;;  %2529 = vmatprep.mubr.msk.bf16.mxu0 %vm1084_vm5, %v563_v44  ;;  %v506_v51 = vpop.f32.mrb[18].mxu1  ;;  %v2930_v40 = vld [vmem:[#allocation5 + $0xac] ss:$12 sps:$4 sm:$0xff]   ;;  %v2928_v42 = vld [vmem:[#allocation5 + $0xa8] ss:$12 sps:$4 sm:$0xff]  }
 0x12b   :  { %v552_v52 = vadd.f32 %v538_v43, %v504_v48  ;;  %2530 = vmatprep.mubr.msk.bf16.mxu1 %vm1084_vm5, %v563_v44  ;;  %v2758_v53 = vpop.f32.mrb[19].mxu1  ;;  %v2970_v43 = vld [vmem:[#allocation5 + $0xb0] ss:$12 sps:$4 sm:$0xff]   ;;  %v2931_v45 = vld [vmem:[#allocation5 + $0xc0] ss:$12 sps:$4 sm:$0xff]  }
 0x12c   :  { %1138 = vmatpush1.bf16.msra.mxu0 %v2887_v46  ;;  %1219 = vmatpush1.bf16.msra.mxu1 %v2890_v47  ;;  %v2933_v44 = vld [vmem:[#allocation5 + $0xc4] ss:$12 sps:$4 sm:$0xff]   ;;  %v2938_v46 = vld [vmem:[#allocation5 + $0xdc] ss:$12 sps:$4 sm:$0xff]   ;;  %v2943_v48 = vld [vmem:[#allocation5 + $0xf4] ss:$12 sps:$4 sm:$0xff]  }
 0x12d   :  { %v559_v57 = vmax.f32 %v552_v52, 0.0  ;;  %1139 = vmatprep.subr.bf16.mxu0 %v2893_v49  ;;  %1220 = vmatprep.subr.bf16.mxu1 %v3122_v3  ;;  %v2936_v47 = vld [vmem:[#allocation5 + $0xd8] ss:$12 sps:$4 sm:$0xff]   ;;  %v2941_v49 = vld [vmem:[#allocation5 + $0xf0] ss:$12 sps:$4 sm:$0xff]  }
 0x12e   :  { %v2948_v50 = vld [vmem:[#allocation5 + $0x10c] ss:$12 sps:$4 sm:$0xff]   ;;  %v2946_v51 = vld [vmem:[#allocation5 + $0x108] ss:$12 sps:$4 sm:$0xff]   ;;  %v2953_v52 = vld [vmem:[#allocation5 + $0x124] ss:$12 sps:$4 sm:$0xff]  }
 0x12f   :  { %v566_v59 = vpack.c.bf16 %v559_v57, %v559_v57  ;;  %v2951_v53 = vld [vmem:[#allocation5 + $0x120] ss:$12 sps:$4 sm:$0xff]   ;;  %v2974_v1 = vld [vmem:[#allocation5 + $0x188] ss:$12 sps:$4 sm:$0xff]   ;;  %v2975_v6 = vld [vmem:[#allocation5 + $0x198] ss:$12 sps:$4 sm:$0xff]  }
 0x130   :  { %1140 = vmatpush1.bf16.msra.mxu0 %v2891_v54  ;;  %1221 = vmatpush1.bf16.msra.mxu1 %v2894_v55  ;;  %v2958_v54 = vld [vmem:[#allocation5 + $0x13c] ss:$12 sps:$4 sm:$0xff]   ;;  %v2956_v55 = vld [vmem:[#allocation5 + $0x138] ss:$12 sps:$4 sm:$0xff]   ;;  %v2963_v57 = vld [vmem:[#allocation5 + $0x154] ss:$12 sps:$4 sm:$0xff]  }
 0x131   :  { %1380 = vrot.lane.b32.xlu1 %v566_v59, %s3125_s4  ;;  %1141 = vmatprep.subr.bf16.mxu0 %v2897_v58  ;;  %v2961_v58 = vld [vmem:[#allocation5 + $0x150] ss:$12 sps:$4 sm:$0xff]   ;;  %v2968_v59 = vld [vmem:[#allocation5 + $0x16c] ss:$12 sps:$4 sm:$0xff]  }
 0x132   :  { %1222 = vmatprep.subr.bf16.mxu1 %v3122_v3 }
 0x134   :  { %1142 = vmatpush1.bf16.msra.mxu0 %v2895_v60  ;;  %1223 = vmatpush1.bf16.msra.mxu1 %v2898_v61  ;;  %v2966_v60 = vld [vmem:[#allocation5 + $0x168] ss:$12 sps:$4 sm:$0xff]   ;;  %v2973_v61 = vld [vmem:[#allocation5 + $0x184] ss:$12 sps:$4 sm:$0xff]  }
 0x135   :  { %1143 = vmatprep.subr.bf16.mxu0 %v2901_v63  ;;  %1224 = vmatprep.subr.bf16.mxu1 %v3122_v3 }
 0x138   :  { %1144 = vmatpush1.bf16.msra.mxu0 %v2899_v4  ;;  %1225 = vmatpush1.bf16.msra.mxu1 %v2902_v0  ;;  %v2971_v0 = vld [vmem:[#allocation5 + $0x180] ss:$12 sps:$4 sm:$0xff]  }
 0x139   :  { %1145 = vmatprep.subr.bf16.mxu0 %v2905_v2  ;;  %1226 = vmatprep.subr.bf16.mxu1 %v3122_v3 }
 0x13c   :  { %1146 = vmatpush1.bf16.msra.mxu0 %v2903_v5  ;;  %1227 = vmatpush1.bf16.msra.mxu1 %v2906_v38  ;;  %v2977_v5 = vld [vmem:[#allocation5 + $0x19c] ss:$12 sps:$4 sm:$0xff]  }
 0x13d   :  { %1792 = vmatprep.subr.bf16.mxu1 %v2909_v7  ;;  %2674 = vmatprep.subr.bf16.mxu0 %v2934_v8  ;;  %v2978_v7 = vld [vmem:[#allocation5 + $0x1a0] ss:$12 sps:$4 sm:$0xff]  }
 0x13e   :  { %v2981_v8 = vld [vmem:[#allocation5 + $0x1b4] ss:$12 sps:$4 sm:$0xff]  }
 0x13f   :  { %1162 = vmatmul.mubr.bf16.vlgmr.msra.gmra.mrb[12].mxu0 %v562_v11  ;;  %1243 = vmatmul.mubr.bf16.vlgmr.msra.gmra.mrb[24].mxu1 %v562_v11  ;;  %v2982_v11 = vld [vmem:[#allocation5 + $0x1b8] ss:$12 sps:$4 sm:$0xff]  }
 0x140   :  { %1793 = vmatpush1.bf16.msra.mxu1 %v2907_v9  ;;  %2675 = vmatpush3.bf16.msra.mxu0 %v2935_v10  ;;  %v2979_v10 = vld [vmem:[#allocation5 + $0x1b0] ss:$12 sps:$4 sm:$0xff]  }
 0x141   :  { %1794 = vmatprep.subr.bf16.mxu1 %v2912_v12  ;;  %2676 = vmatprep.subr.bf16.mxu0 %v2939_v13  ;;  %v2985_v12 = vld [vmem:[#allocation5 + $0x1cc] ss:$12 sps:$4 sm:$0xff]   ;;  %v2983_v13 = vld [vmem:[#allocation5 + $0x1c8] ss:$12 sps:$4 sm:$0xff]  }
 0x144   :  { %1795 = vmatpush1.bf16.msra.mxu1 %v2910_v14  ;;  %2677 = vmatpush3.bf16.msra.mxu0 %v2940_v15  ;;  %v2986_v14 = vld [vmem:[#allocation5 + $0x1d0] ss:$12 sps:$4 sm:$0xff]  }
 0x145   :  { %1796 = vmatprep.subr.bf16.mxu1 %v2915_v16  ;;  %2678 = vmatprep.subr.bf16.mxu0 %v2944_v17  ;;  %v2989_v15 = vld [vmem:[#allocation5 + $0x1e4] ss:$12 sps:$4 sm:$0xff]   ;;  %v2987_v16 = vld [vmem:[#allocation5 + $0x1e0] ss:$12 sps:$4 sm:$0xff]   ;;  %v2990_v17 = vld [vmem:[#allocation5 + $0x1e8] ss:$12 sps:$4 sm:$0xff]  }
 0x148   :  { %1797 = vmatpush1.bf16.msra.mxu1 %v2913_v18  ;;  %2679 = vmatpush3.bf16.msra.mxu0 %v2945_v19  ;;  %v2993_v18 = vld [vmem:[#allocation5 + $0x1fc] ss:$12 sps:$4 sm:$0xff]   ;;  %v2991_v19 = vld [vmem:[#allocation5 + $0x1f8] ss:$12 sps:$4 sm:$0xff]  }
 0x149   :  { %1798 = vmatprep.subr.bf16.mxu1 %v2918_v20  ;;  %2680 = vmatprep.subr.bf16.mxu0 %v2949_v21  ;;  %v2994_v20 = vld [vmem:[#allocation5 + $0x200] ss:$12 sps:$4 sm:$0xff]  }
 0x14a   :  { %v2997_v21 = vld [vmem:[#allocation5 + $0x214] ss:$12 sps:$4 sm:$0xff]  }
 0x14c   :  { %1799 = vmatpush1.bf16.msra.mxu1 %v2916_v22  ;;  %2681 = vmatpush3.bf16.msra.mxu0 %v2950_v23  ;;  %v2995_v22 = vld [vmem:[#allocation5 + $0x210] ss:$12 sps:$4 sm:$0xff]   ;;  %v2998_v23 = vld [vmem:[#allocation5 + $0x218] ss:$12 sps:$4 sm:$0xff]  }
 0x14d   :  { %1800 = vmatprep.subr.bf16.mxu1 %v2921_v24  ;;  %2682 = vmatprep.subr.bf16.mxu0 %v2954_v25  ;;  %v3001_v24 = vld [vmem:[#allocation5 + $0x22c] ss:$12 sps:$4 sm:$0xff]   ;;  %v2999_v25 = vld [vmem:[#allocation5 + $0x228] ss:$12 sps:$4 sm:$0xff]  }
 0x150   :  { %1801 = vmatpush1.bf16.msra.mxu1 %v2919_v26  ;;  %2683 = vmatpush3.bf16.msra.mxu0 %v2955_v27  ;;  %v3002_v26 = vld [vmem:[#allocation5 + $0x230] ss:$12 sps:$4 sm:$0xff]  }
 0x151   :  { %1802 = vmatprep.subr.bf16.mxu1 %v2924_v28  ;;  %2684 = vmatprep.subr.bf16.mxu0 %v2959_v29  ;;  %v3005_v27 = vld [vmem:[#allocation5 + $0x244] ss:$12 sps:$4 sm:$0xff]   ;;  %v3003_v28 = vld [vmem:[#allocation5 + $0x240] ss:$12 sps:$4 sm:$0xff]   ;;  %v3006_v29 = vld [vmem:[#allocation5 + $0x248] ss:$12 sps:$4 sm:$0xff]  }
 0x154   :  { %1803 = vmatpush1.bf16.msra.mxu1 %v2922_v30  ;;  %2685 = vmatpush3.bf16.msra.mxu0 %v2960_v32  ;;  %v3007_v30 = vld [vmem:[%s3502_s9 + $0x40] sm:$0xff]  }
 0x155   :  { %1804 = vmatprep.subr.bf16.mxu1 %v2927_v33  ;;  %2686 = vmatprep.subr.bf16.mxu0 %v2964_v34  ;;  %v3008_v32 = vld [vmem:[%s3502_s9] sm:$0xff]   ;;  %v3009_v33 = vld [vmem:[%s3502_s9 + $0x48] sm:$0xff]  }
 0x158   :  { %1805 = vmatpush1.bf16.msra.mxu1 %v2925_v35  ;;  %2687 = vmatpush3.bf16.msra.mxu0 %v2965_v36  ;;  %v3011_v35 = vld [vmem:[%s3502_s9 + $0x50] sm:$0xff]  }
 0x159   :  { %1806 = vmatprep.subr.bf16.mxu1 %v2930_v40  ;;  %2688 = vmatprep.subr.bf16.mxu0 %v2969_v41  ;;  %v3012_v36 = vld [vmem:[%s3502_s9 + $0x10] sm:$0xff]   ;;  %v3013_v40 = vld [vmem:[%s3502_s9 + $0x58] sm:$0xff]  }
 0x15a   :  { %v3014_v41 = vld [vmem:[%s3502_s9 + $0x18] sm:$0xff]  }
 0x15c   :  { %1807 = vmatpush1.bf16.msra.mxu1 %v2928_v42  ;;  %2689 = vmatpush3.bf16.msra.mxu0 %v2970_v43  ;;  %v3015_v42 = vld [vmem:[%s3502_s9 + $0x60] sm:$0xff]  }
 0x15d   :  { %1808 = vmatprep.subr.bf16.mxu1 %v2933_v44  ;;  %1914 = vmatprep.subr.bf16.mxu0 %v3122_v3  ;;  %v3016_v43 = vld [vmem:[%s3502_s9 + $0x20] sm:$0xff]   ;;  %v3017_v44 = vld [vmem:[%s3502_s9 + $0x68] sm:$0xff]  }
 0x160   :  { %1809 = vmatpush1.bf16.msra.mxu1 %v2931_v45  ;;  %v3018_v45 = vld [vmem:[%s3502_s9 + $0x28] sm:$0xff]  }
 0x161   :  { %1810 = vmatprep.subr.bf16.mxu1 %v2938_v46  ;;  %v3019_v46 = vld [vmem:[%s3502_s9 + $0x70] sm:$0xff]  }
 0x164   :  { %1811 = vmatpush1.bf16.msra.mxu1 %v2936_v47  ;;  %v3020_v47 = vld [vmem:[%s3502_s9 + $0x30] sm:$0xff]  }
 0x165   :  { %1812 = vmatprep.subr.bf16.mxu1 %v2943_v48  ;;  %v3021_v48 = vld [vmem:[%s3502_s9 + $0x78] sm:$0xff]  }
 0x168   :  { %1813 = vmatpush1.bf16.msra.mxu1 %v2941_v49  ;;  %v3022_v49 = vld [vmem:[%s3502_s9 + $0x38] sm:$0xff]  }
 0x169   :  { %1814 = vmatprep.subr.bf16.mxu1 %v2948_v50  ;;  %v667_v50 = vld [vmem:[%s3499_s6] sm:$0x7] }
 0x16c   :  { %1815 = vmatpush1.bf16.msra.mxu1 %v2946_v51 }
 0x16d   :  { %1816 = vmatprep.subr.bf16.mxu1 %v2953_v52  ;;  %v680_v52 = vrot.slane %v667_v50, %v3312_v56 }
 0x170   :  { %1817 = vmatpush1.bf16.msra.mxu1 %v2951_v53 }
 0x171   :  { %1818 = vmatprep.subr.bf16.mxu1 %v2958_v54 }
 0x174   :  { %1819 = vmatpush1.bf16.msra.mxu1 %v2956_v55 }
 0x175   :  { %1820 = vmatprep.subr.bf16.mxu1 %v2963_v57 }
 0x178   :  { %1821 = vmatpush1.bf16.msra.mxu1 %v2961_v58 }
 0x179   :  { %1822 = vmatprep.subr.bf16.mxu1 %v2968_v59  ;;  %v672_v59 = vrot.slane %v667_v50, %v3275_v37 }
 0x17c   :  { %1823 = vmatpush1.bf16.msra.mxu1 %v2966_v60  ;;  %v676_v60 = vrot.slane %v667_v50, %v3283_v39 }
 0x17d   :  { %1833 = vmatprep.subr.bf16.mxu1 %v2973_v61 }
 0x193   :  { %v1377_v62 = vpop.permute.xlu0 %1376 }
 0x197   :  { %v3323_v63 = vpop.permute.xlu0 %1378 }
 0x198   :  { %v1384_v4 = vsel %vm1382_vm6, %v1377_v62, %v3323_v63 }
 0x199   :  { %1824 = vmatprep.mubr.bf16.mxu1 %v1384_v4  ;;  %1906 = vmatprep.mubr.bf16.mxu0 %v1384_v4 }
 0x19c   :  { %v1375_v2 = vpop.permute.xlu1 %1374 }
 0x19d   :  { %v1383_v38 = vsel %vm1382_vm6, %v1375_v2, %v1377_v62 }
 0x19e   :  { %1825 = vmatmul.mubr.bf16.vlgmr.msra.gmra.mrb[28].mxu1 %v1383_v38  ;;  %1907 = vmatmul.mubr.bf16.vlgmr.msra.gmra.mrb[16].mxu0 %v1383_v38 }
 0x19f   :  { %1834 = vmatpush1.bf16.msra.mxu1 %v2971_v0  ;;  %1915 = vmatpush1.bf16.msra.mxu0 %v2974_v1 }
 0x1a0   :  { %1835 = vmatprep.subr.bf16.mxu1 %v2977_v5  ;;  %1916 = vmatprep.subr.bf16.mxu0 %v3122_v3 }
 0x1a3   :  { %1836 = vmatpush1.bf16.msra.mxu1 %v2975_v6  ;;  %1917 = vmatpush1.bf16.msra.mxu0 %v2978_v7  ;;  %v1381_v9 = vpop.permute.xlu1 %1380 }
 0x1a4   :  { %2606 = vmatprep.mubr.msk.bf16.mxu1 %vm1084_vm5, %v1381_v9  ;;  %2607 = vmatprep.mubr.msk.bf16.mxu0 %vm1084_vm5, %v1381_v9  ;;  %v1385_v34 = vsel %vm1382_vm6, %v3323_v63, %v1381_v9 }
 0x1a5   :  { %1837 = vmatprep.subr.bf16.mxu1 %v2981_v8  ;;  %1918 = vmatprep.subr.bf16.mxu0 %v3122_v3 }
 0x1a7   :  { %1838 = vmatpush1.bf16.msra.mxu1 %v2979_v10  ;;  %1919 = vmatpush1.bf16.msra.mxu0 %v2982_v11 }
 0x1a8   :  { %1839 = vmatprep.subr.bf16.mxu1 %v2985_v12  ;;  %1920 = vmatprep.subr.bf16.mxu0 %v3122_v3  ;;  %v3023_v12 = vld [vmem:[%s3502_s9 + $0xc0] sm:$0xff]  }
 0x1ab   :  { %1840 = vmatpush1.bf16.msra.mxu1 %v2983_v13  ;;  %1921 = vmatpush1.bf16.msra.mxu0 %v2986_v14  ;;  %v3024_v14 = vld [vmem:[%s3502_s9 + $0x80] sm:$0xff]  }
 0x1ac   :  { %1841 = vmatprep.subr.bf16.mxu1 %v2989_v15  ;;  %1922 = vmatprep.subr.bf16.mxu0 %v3122_v3 }
 0x1af   :  { %1842 = vmatpush1.bf16.msra.mxu1 %v2987_v16  ;;  %1923 = vmatpush1.bf16.msra.mxu0 %v2990_v17  ;;  %v3025_v16 = vld [vmem:[%s3502_s9 + $0xc8] sm:$0xff]  }
 0x1b0   :  { %1843 = vmatprep.subr.bf16.mxu1 %v2993_v18  ;;  %1924 = vmatprep.subr.bf16.mxu0 %v3122_v3 }
 0x1b3   :  { %1844 = vmatpush1.bf16.msra.mxu1 %v2991_v19  ;;  %1925 = vmatpush1.bf16.msra.mxu0 %v2994_v20  ;;  %v3026_v19 = vld [vmem:[%s3502_s9 + $0x88] sm:$0xff]   ;;  %v3029_v20 = vld [vmem:[%s3502_s9 + $0x100] sm:$0xff]  }
 0x1b4   :  { %1845 = vmatprep.subr.bf16.mxu1 %v2997_v21  ;;  %1926 = vmatprep.subr.bf16.mxu0 %v3122_v3 }
 0x1b7   :  { %1846 = vmatpush1.bf16.msra.mxu1 %v2995_v22  ;;  %1927 = vmatpush1.bf16.msra.mxu0 %v2998_v23  ;;  %v3027_v22 = vld [vmem:[%s3502_s9 + $0xd0] sm:$0xff]   ;;  %v3032_v23 = vld [vmem:[%s3502_s9 + $0x108] sm:$0xff]  }
 0x1b8   :  { %1847 = vmatprep.subr.bf16.mxu1 %v3001_v24  ;;  %1928 = vmatprep.subr.bf16.mxu0 %v3122_v3  ;;  %v3028_v24 = vld [vmem:[%s3502_s9 + $0x90] sm:$0xff]  }
 0x1bb   :  { %1848 = vmatpush1.bf16.msra.mxu1 %v2999_v25  ;;  %1929 = vmatpush1.bf16.msra.mxu0 %v3002_v26  ;;  %v3030_v25 = vld [vmem:[%s3502_s9 + $0xd8] sm:$0xff]   ;;  %v3035_v26 = vld [vmem:[%s3502_s9 + $0x110] sm:$0xff]  }
 0x1bc   :  { %1849 = vmatprep.subr.bf16.mxu1 %v3005_v27  ;;  %1930 = vmatprep.subr.bf16.mxu0 %v3122_v3  ;;  %v3010_v3 = vld [vmem:[%s3502_s9 + $0x8] sm:$0xff]   ;;  %v3031_v27 = vld [vmem:[%s3502_s9 + $0x98] sm:$0xff]  }
 0x1bf   :  { %1850 = vmatpush1.bf16.msra.mxu1 %v3003_v28  ;;  %1931 = vmatpush1.bf16.msra.mxu0 %v3006_v29  ;;  %v3033_v28 = vld [vmem:[%s3502_s9 + $0xe0] sm:$0xff]   ;;  %v3038_v29 = vld [vmem:[%s3502_s9 + $0x118] sm:$0xff]  }
 0x1c0   :  { %2696 = vmatprep.subr.bf16.mxu0 %v3007_v30  ;;  %2718 = vmatprep.subr.bf16.mxu1 %v3023_v12  ;;  %v3034_v30 = vld [vmem:[%s3502_s9 + $0xa0] sm:$0xff]  }
 0x1c1   :  { %v2608_v12 = vld [vmem:[%s3503_s10] ss:$0 sm:$0xff] }
 0x1c2   :  { %1866 = vmatmul.mubr.bf16.vlgmr.msra.gmra.mrb[28].mxu1 %v1385_v34  ;;  %1947 = vmatmul.mubr.bf16.vlgmr.msra.gmra.mrb[20].mxu0 %v1385_v34  ;;  %v3037_v34 = vld [vmem:[%s3502_s9 + $0xa8] sm:$0xff]  }
 0x1c3   :  { %2697 = vmatpush3.bf16.msra.mxu0 %v3008_v32  ;;  %2719 = vmatpush3.bf16.msra.mxu1 %v3024_v14  ;;  %v3036_v32 = vld [vmem:[%s3502_s9 + $0xe8] sm:$0xff]  }
 0x1c4   :  { %2698 = vmatprep.subr.bf16.mxu0 %v3009_v33  ;;  %2720 = vmatprep.subr.bf16.mxu1 %v3025_v16  ;;  %v3041_v33 = vld [vmem:[%s3502_s9 + $0x120] sm:$0xff]  }
 0x1c7   :  { %2699 = vmatpush3.bf16.msra.mxu0 %v3010_v3  ;;  %2721 = vmatpush3.bf16.msra.mxu1 %v3026_v19  ;;  %v3039_v3 = vld [vmem:[%s3502_s9 + $0xf0] sm:$0xff]  }
 0x1c8   :  { %2700 = vmatprep.subr.bf16.mxu0 %v3011_v35  ;;  %2722 = vmatprep.subr.bf16.mxu1 %v3027_v22  ;;  %v3040_v35 = vld [vmem:[%s3502_s9 + $0xb0] sm:$0xff]  }
 0x1cb   :  { %2701 = vmatpush3.bf16.msra.mxu0 %v3012_v36  ;;  %2723 = vmatpush3.bf16.msra.mxu1 %v3028_v24  ;;  %v3042_v36 = vld [vmem:[%s3502_s9 + $0xf8] sm:$0xff]  }
 0x1cc   :  { %2702 = vmatprep.subr.bf16.mxu0 %v3013_v40  ;;  %2724 = vmatprep.subr.bf16.mxu1 %v3030_v25  ;;  %v1353_v40 = vld [vmem:[%s3501_s8] sm:$0x7]  ;;  %s3126_s8 = smov 44  }
 0x1cf   :  { %2703 = vmatpush3.bf16.msra.mxu0 %v3014_v41  ;;  %2725 = vmatpush3.bf16.msra.mxu1 %v3031_v27  ;;  %v3044_v41 = vld [vmem:[%s3502_s9 + $0x128] ss:$0 sps:$4 sm:$0xff]  }
 0x1d0   :  { %2704 = vmatprep.subr.bf16.mxu0 %v3015_v42  ;;  %2726 = vmatprep.subr.bf16.mxu1 %v3033_v28  ;;  %v1366_v42 = vrot.slane %v1353_v40, %v3312_v56 }
 0x1d3   :  { %2705 = vmatpush3.bf16.msra.mxu0 %v3016_v43  ;;  %2727 = vmatpush3.bf16.msra.mxu1 %v3034_v30  ;;  %v2293_v43 = vsel %vm324_vm1, %v3044_v41, 0 }
 0x1d4   :  { %2706 = vmatprep.subr.bf16.mxu0 %v3017_v44  ;;  %2728 = vmatprep.subr.bf16.mxu1 %v3036_v32  ;;  %v1358_v44 = vrot.slane %v1353_v40, %v3275_v37 }
 0x1d7   :  { %2707 = vmatpush3.bf16.msra.mxu0 %v3018_v45  ;;  %2729 = vmatpush3.bf16.msra.mxu1 %v3037_v34  ;;  %v1362_v45 = vrot.slane %v1353_v40, %v3283_v39 }
 0x1d8   :  { %2708 = vmatprep.subr.bf16.mxu0 %v3019_v46  ;;  %2730 = vmatprep.subr.bf16.mxu1 %v3039_v3 }
 0x1db   :  { %2709 = vmatpush3.bf16.msra.mxu0 %v3020_v47  ;;  %2731 = vmatpush3.bf16.msra.mxu1 %v3040_v35 }
 0x1dc   :  { %2710 = vmatprep.subr.bf16.mxu0 %v3021_v48  ;;  %2732 = vmatprep.subr.bf16.mxu1 %v3042_v36 }
 0x1df   :  { %2711 = vmatpush3.bf16.msra.mxu0 %v3022_v49 }
 0x1e0   :  { %2759 = vmatprep.subr.bf16.mxu0 %v3123_v31 }
 0x1ee   :  { %v2668_v51 = vpop.f32.mrb[20].mxu1 }
 0x1ef   :  { %v2669_v53 = vpop.f32.mrb[21].mxu1 }
 0x1f0   :  { %v2670_v54 = vadd.f32 %v2669_v53, %v2668_v51  ;;  %v2671_v55 = vpop.f32.mrb[22].mxu1 }
 0x1f1   :  { %v2672_v57 = vpop.f32.mrb[23].mxu1 }
 0x1f2   :  { %v1205_v58 = vadd.f32 %v2670_v54, %v680_v52 }
 0x212   :  { %v1163_v61 = vpop.f32.mrb[12].mxu0  ;;  %v1244_v62 = vpop.f32.mrb[24].mxu1 }
 0x213   :  { %v2775_v63 = vadd.f32 %v1163_v61, %v672_v59  ;;  %v3395_v4 = vadd.f32 %v1244_v62, %v1205_v58  ;;  %v1165_v0 = vpop.f32.mrb[13].mxu0  ;;  %v1246_v1 = vpop.f32.mrb[25].mxu1 }
 0x214   :  { %v2776_v2 = vadd.f32 %v1165_v0, %v676_v60  ;;  %v1167_v5 = vpop.f32.mrb[14].mxu0  ;;  %v1247_v38 = vpop.f32.mrb[26].mxu1 }
 0x215   :  { %v1250_v6 = vmax.f32 %v2775_v63, 0.0  ;;  %v1168_v7 = vpop.f32.mrb[15].mxu0  ;;  %v1248_v8 = vpop.f32.mrb[27].mxu1  ;;  %v1252_v5 = vmax.f32 %v3395_v4, 0.0 }
 0x216   :  { %v1251_v9 = vmax.f32 %v2776_v2, 0.0 }
 0x217   :  { %v1957_v11 = vpack.c.bf16 %v1250_v6, %v1250_v6  ;;  %v1959_v6 = vpack.c.bf16 %v1252_v5, %v1252_v5 }
 0x218   :  { %v1958_v10 = vpack.c.bf16 %v1251_v9, %v1251_v9 }
 0x21a   :  { %2327 = vmatprep.mubr.bf16.mxu0 %v1958_v10 }
 0x21b   :  { %2328 = vmatmul.mubr.bf16.vlgmr.msra.gmra.mrb[24].mxu0 %v1957_v11 }
 0x21c   :  { %2771 = vmatprep.mubr.msk.bf16.mxu0 %vm3124_vm4, %v3123_v31  ;;  %2760 = vmatpush3.bf16.msra.mxu0 %v3029_v20 }
 0x21d   :  { %2761 = vmatprep.subr.bf16.mxu0 %v3123_v31 }
 0x220   :  { %2762 = vmatpush3.bf16.msra.mxu0 %v3032_v23 }
 0x221   :  { %2763 = vmatprep.subr.bf16.mxu0 %v3123_v31 }
 0x224   :  { %2764 = vmatpush3.bf16.msra.mxu0 %v3035_v26 }
 0x225   :  { %2765 = vmatprep.subr.bf16.mxu0 %v3123_v31 }
 0x228   :  { %2766 = vmatpush3.bf16.msra.mxu0 %v3038_v29 }
 0x229   :  { %2767 = vmatprep.subr.bf16.mxu0 %v3123_v31 }
 0x22c   :  { %2768 = vmatpush3.bf16.msra.mxu0 %v3041_v33 }
 0x22d   :  { %2769 = vmatprep.subr.bf16.mxu0 %v3123_v31  ;;  %v3043_v31 = vld [vmem:[%s3502_s9 + $0xb8] sm:$0xff]  }
 0x22e   :  { %2733 = vmatpush3.bf16.msra.mxu1 %v3043_v31 }
 0x230   :  { %2770 = vmatpush3.bf16.msra.mxu0 %v2293_v43 }
 0x271   :  { %v2690_v13 = vpop.f32.mrb[16].mxu0 }
 0x272   :  { %v2691_v15 = vpop.f32.mrb[17].mxu0 }
 0x273   :  { %v2692_v17 = vadd.f32 %v2691_v15, %v2690_v13  ;;  %v2693_v18 = vpop.f32.mrb[18].mxu0 }
 0x274   :  { %v2694_v21 = vpop.f32.mrb[19].mxu0 }
 0x275   :  { %v1909_v46 = vadd.f32 %v2692_v17, %v1366_v42 }
 0x295   :  { %v1867_v47 = vpop.f32.mrb[28].mxu1  ;;  %v1948_v48 = vpop.f32.mrb[20].mxu0 }
 0x296   :  { %v2777_v49 = vadd.f32 %v1867_v47, %v1358_v44  ;;  %v1949_v50 = vadd.f32 %v1948_v48, %v1909_v46  ;;  %v1869_v51 = vpop.f32.mrb[29].mxu1  ;;  %v1950_v52 = vpop.f32.mrb[21].mxu0 }
 0x297   :  { %v2778_v53 = vadd.f32 %v1869_v51, %v1362_v45  ;;  %v1871_v54 = vpop.f32.mrb[30].mxu1  ;;  %v1951_v55 = vpop.f32.mrb[22].mxu0 }
 0x298   :  { %v1954_v57 = vmax.f32 %v2777_v49, 0.0  ;;  %v1872_v58 = vpop.f32.mrb[31].mxu1  ;;  %v1952_v56 = vpop.f32.mrb[23].mxu0  ;;  %v1956_v61 = vmax.f32 %v1949_v50, 0.0 }
 0x299   :  { %v1955_v59 = vmax.f32 %v2778_v53, 0.0 }
 0x29a   :  { %v1960_v60 = vpack.c.bf16 %v1954_v57, %v1954_v57  ;;  %v1962_v37 = vpack.c.bf16 %v1956_v61, %v1956_v61 }
 0x29b   :  { %v1961_v62 = vpack.c.bf16 %v1955_v59, %v1955_v59 }
 0x29c   :  { %1966 = vrot.lane.b32.xlu0 %v1960_v60, %s3126_s8 }
 0x29d   :  { %1968 = vrot.lane.b32.xlu1 %v1961_v62, %s3126_s8 }
 0x2a0   :  { %1970 = vrot.lane.b32.xlu0 %v1962_v37, %s3126_s8 }
 0x2ee   :  { %v2712_v39 = vpop.f32.mrb[24].mxu0 }
 0x2ef   :  { %v2713_v63 = vpop.f32.mrb[25].mxu0 }
 0x2f0   :  { %v2714_v0 = vadd.f32 %v2713_v63, %v2712_v39  ;;  %v2715_v1 = vpop.f32.mrb[26].mxu0 }
 0x2f1   :  { %v2716_v2 = vpop.f32.mrb[27].mxu0 }
 0x2f2   :  { %v2330_v15 = vadd.f32 %v2714_v0, %v2608_v12 }
 0x30e   :  { %v1967_v38 = vpop.permute.xlu0 %1966 }
 0x30f   :  { %v1969_v7 = vpop.permute.xlu1 %1968  ;;  %v1979_v9 = vsel %vm1972_vm7, %v1959_v6, %v1967_v38 }
 0x310   :  { %v1973_v8 = vsel %vm1972_vm7, %v1967_v38, %v1969_v7 }
 0x311   :  { %2367 = vmatprep.mubr.bf16.mxu1 %v1973_v8 }
 0x312   :  { %2368 = vmatmul.mubr.bf16.vlgmr.msra.gmra.mrb[32].mxu1 %v1979_v9  ;;  %v1971_v10 = vpop.permute.xlu0 %1970 }
 0x313   :  { %v1974_v11 = vsel %vm1972_vm7, %v1969_v7, %v1971_v10 }
 0x314   :  { %2772 = vmatmul.mubr.msk.bf16.vlgmr.msra.gmra.mrb[28].mxu0 %vm2288_vm8, %v1974_v11 }
 0x3e5   :  { %v2734_v13 = vpop.f32.mrb[32].mxu1 }
 0x3e6   :  { %v2735_v14 = vpop.f32.mrb[33].mxu1 }
 0x3e7   :  { %v2736_v4 = vadd.f32 %v2735_v14, %v2734_v13  ;;  %v2737_v16 = vpop.f32.mrb[34].mxu1  ;;  %v2409_v17 = vpop.f32.mrb[28].mxu0 }
 0x3e8   :  { %v2738_v18 = vpop.f32.mrb[35].mxu1  ;;  %v2773_v19 = vpop.f32.mrb[29].mxu0 }
 0x3e9   :  { %v2370_v20 = vadd.f32 %v2736_v4, %v2330_v15  ;;  %v2412_v21 = vpop.f32.mrb[30].mxu0 }
 0x3ea   :  { %v2774_v22 = vpop.f32.mrb[31].mxu0 }
 0x3eb   :  { %v2410_v23 = vadd.f32 %v2409_v17, %v2370_v20 }
 0x3ed   :  { %2416 = vst.msk [vmem:[#allocation7] sm:$0x3] %vm2415_vm9, %v2410_v23 }
 0x3ee   :  { %3100 = shalt.err (!%p3097_p6)
}
 0x3ef   :  { %s3101_s5 = scalar_lea.hbm %s3504_s11, 32 }
 0x3f0   :  { %p3102_p7 = scmp.ne.s32.totalorder %s3504_s11, %s3101_s5  ;;  %p3105_p8 = scmp.lt.u32.totalorder %s3101_s5, %s3504_s11 }
 0x3f2   :  { %p3107_p9 = pnand %p3105_p8, %p3102_p7 }
 0x3f4   :  { %3110 = shalt.err (!%p3107_p9)
}
 0x3f5   :  { %2426 = dma.vmem_to_hbm [thread:$0]  %s2424_s20, 32, %s3504_s11, [#allocation4]  }
 0x3f6   :  { %3115 = dma.done.wait [#allocation4], 32  }
 0x3f7   :  { %3116 = vsyncadd [#allocation4], 4294967264 }
 0x3f8   :  { %2430 = vsyncpa [#allocation3], 1 }
 0x3f9   :  { %2431 = vsyncpa [#allocation6], 1 }
 0x3fa   :  { %2432 = vsyncpa [#allocation4], 1 }

</bundles_post_ra>
